<compile_context>
chip_gen: v7x
topology: tpu7x:2x2x1
jax: 0.10.0
libtpu: 0.0.40
codegen_flags: <defaults>
</compile_context>

<pallas_src>
import functools

import jax
import jax.numpy as jnp
from jax.experimental import pallas as pl
from jax.experimental.pallas import tpu as pltpu

LANES = 128                      # vreg lane width -- keep last dim lane-dense
MAX_BLOCK_ROWS = 4096            # 4096 x 128 f32 = 2 MiB/block; ~8 MiB pipelined total
MIN_GRID_STEPS = 2               # >=2 parallel grid steps so both v7x TCs see work
VMEM_LIMIT_BYTES = 32 * 1024 * 1024  # safe on v5e/v6e/v7x, well above our ~8 MiB need


def _sublane_multiple(dtype) -> int:
    # f32 -> 8, bf16/f16 -> 16, int8/fp8 -> 32 (packed dtypes stack along sublanes).
    return max(8, 32 // jnp.dtype(dtype).itemsize)


def _round_up(a, b):
    return ((a + b - 1) // b) * b


def _sine_kernel(w0_ref, x_ref, o_ref):
    # Elementwise sin(w0 * x). Compute in f32 (single upcast/downcast for packed
    # dtypes), whole tile resident in VMEM. Pure VPU/EUP work -- no MXU, no XLU.
    w0 = w0_ref[0]
    x = x_ref[...].astype(jnp.float32)
    o_ref[...] = jnp.sin(w0 * x).astype(o_ref.dtype)


def sine(x, w0=1.0):
    """Pallas equivalent of torch.sin(w0 * x) for arbitrary-shaped x."""
    orig_shape, dtype = x.shape, x.dtype
    flat = x.reshape(-1)
    n = flat.shape[0]

    sub = _sublane_multiple(dtype)

    # Lane-dense layout: (rows, 128). Pad only to (sublane x lane) granularity.
    rows = pl.cdiv(max(n, 1), LANES)
    rows_padded = _round_up(rows, sub)
    total = rows_padded * LANES
    padded = total != n                     # fast path: aligned sizes copy nothing
    if padded:
        flat = jnp.pad(flat, (0, total - n))
    x2 = flat.reshape(rows_padded, LANES)

    # Block rows: as large as possible (amortize per-step overhead), but keep at
    # least MIN_GRID_STEPS blocks; always a multiple of the sublane quantum.
    block_rows = min(
        MAX_BLOCK_ROWS,
        _round_up(pl.cdiv(rows_padded, MIN_GRID_STEPS), sub),
        rows_padded,
    )
    grid = (pl.cdiv(rows_padded, block_rows),)   # ragged final block handled by Pallas

    w0_arr = jnp.asarray(w0, dtype=jnp.float32).reshape(1)

    out2 = pl.pallas_call(
        _sine_kernel,
        out_shape=jax.ShapeDtypeStruct((rows_padded, LANES), dtype),
        grid=grid,
        in_specs=[
            pl.BlockSpec(memory_space=pltpu.MemorySpace.SMEM),     # w0 scalar
            pl.BlockSpec((block_rows, LANES), lambda i: (i, 0)),   # x tile
        ],
        out_specs=pl.BlockSpec((block_rows, LANES), lambda i: (i, 0)),
        compiler_params=pltpu.CompilerParams(
            dimension_semantics=("parallel",),
            vmem_limit_bytes=VMEM_LIMIT_BYTES,
        ),
    )(w0_arr, x2)

    if padded:
        return out2.reshape(-1)[:n].reshape(orig_shape)
    return out2.reshape(orig_shape)


if __name__ == "__main__":
    key = jax.random.PRNGKey(0)
    w0 = 1.0                                   # module default

    # Primary (aligned) case -- exercises the no-copy fast path.
    x = jax.random.normal(key, (2, 4, 16, 16), jnp.float32)
    fwd = jax.jit(functools.partial(sine, w0=w0))
    y = fwd(x)
    jax.block_until_ready(y)
    y_ref = jnp.sin(w0 * x)
    assert y.shape == x.shape, y.shape
    assert jnp.all(jnp.isfinite(y))
    assert jnp.allclose(y, y_ref, atol=1e-6, rtol=1e-6)

    # Secondary (unaligned) case with non-default w0 -- exercises the padded path
    # and the SMEM-scalar w0 handling.
    x2 = jax.random.normal(jax.random.PRNGKey(1), (3, 5, 7), jnp.float32)
    y2 = jax.jit(functools.partial(sine, w0=30.0))(x2)
    jax.block_until_ready(y2)
    assert jnp.allclose(y2, jnp.sin(30.0 * x2), atol=1e-5, rtol=1e-5)

    print("KERNEL_OK")
</pallas_src>

<mosaic_0001>
module attributes {stable_mosaic.version = 11 : i64} {
  func.func @_sine_kernel(%arg0: i32, %arg1: memref<1xf32, #tpu.memory_space<smem>>, %arg2: memref<8x128xf32, #tpu.memory_space<vmem>>, %arg3: memref<8x128xf32, #tpu.memory_space<vmem>>) attributes {dimension_semantics = [#tpu.dimension_semantics<parallel>], iteration_bounds = array<i64: 2>, scalar_prefetch = 0 : i64, scratch_operands = 0 : i64, tpu.core_type = #tpu.core_type<tc>, window_params = [{transform_indices = @transform_0, window_bounds = array<i64: 1>}, {transform_indices = @transform_1, window_bounds = array<i64: 8, 128>}, {transform_indices = @transform_2, window_bounds = array<i64: 8, 128>}]} {
    %c0 = arith.constant 0 : index
    %0 = memref.load %arg1[%c0] : memref<1xf32, #tpu.memory_space<smem>>
    %c0_0 = arith.constant 0 : index
    %c0_1 = arith.constant 0 : index
    %1 = vector.load %arg2[%c0_0, %c0_1] : memref<8x128xf32, #tpu.memory_space<vmem>>, vector<8x128xf32>
    %2 = vector.broadcast %0 : f32 to vector<8x128xf32>
    %3 = arith.mulf %2, %1 : vector<8x128xf32>
    %4 = math.sin %3 : vector<8x128xf32>
    %c0_2 = arith.constant 0 : index
    %c0_3 = arith.constant 0 : index
    %5 = vector.load %arg3[%c0_2, %c0_3] : memref<8x128xf32, #tpu.memory_space<vmem>>, vector<8x128xf32>
    tpu.vector_store %arg3[%c0_2, %c0_3], %4 {strides = array<i32>} : memref<8x128xf32, #tpu.memory_space<vmem>>, vector<8x128xf32>,
    return
  }
  func.func @transform_0(%arg0: i32) -> i32 {
    %c0_i32 = arith.constant 0 : i32
    %c0_i32_0 = arith.constant 0 : i32
    return %c0_i32 : i32
  }
  func.func @transform_1(%arg0: i32) -> (i32, i32) {
    %c0_i32 = arith.constant 0 : i32
    %c0_i32_0 = arith.constant 0 : i32
    return %arg0, %c0_i32 : i32, i32
  }
  func.func @transform_2(%arg0: i32) -> (i32, i32) {
    %c0_i32 = arith.constant 0 : i32
    %c0_i32_0 = arith.constant 0 : i32
    return %arg0, %c0_i32 : i32, i32
  }
}

</mosaic_0001>

<bundles_post_ra>
// kernel: sine.1
= control target key start
LH: loop header
LB: loop body
LE: loop exit
PB: predicated region body
PF: predicated region fallthrough
CT: control target
= control target key end

     0   :  { %s369_s11 = smov 0   ;;  %s414_s0 = inlined_call_operand.<no memory space> [shape: f32[1], index: 0, kind: input, shape index: {}]   ;;  %s415_s1 = inlined_call_operand.vmem [shape: f32[16,128], index: 1, kind: input, shape index: {}]   ;;  %s416_s2 = inlined_call_operand.vmem [shape: f32[16,128], index: 2, kind: output, shape index: {}]  }
   0x1   :  { %7 = sst [smem:[#allocation2]] %s414_s0 }
   0x2 LB: > { %s302_s12 = sadd.s32 4294967295, %s343_s11   ;;  %p306_p0 = scmp.ge.s32.totalorder %s343_s11, 1  ;;  %s343_s11 = sphi %s369_s11, %s13_s11  }
   0x3   : > { %p112_p1 = scmp.lt.s32.totalorder %s343_s11, 3 }
   0x5   : > { %p113_p2 = pnand %p306_p0, %p112_p1 }
   0x6   : > { %p132_p3 = scmp.lt.s32.totalorder (!%p113_p2), %s302_s12, 1  ;;  %s140_s13 = sld [smem:[#allocation2]] (!%p113_p2)  ;;  %v345_v14 = vmov (!%p113_p2), 683565275   ;;  %v346_v16 = vmov (!%p113_p2), 2475754826  }
   0x7   : > { %116 = sbr.rel (%p113_p2) target bundleno = 101 (0x65), region = 28  ;;  %v347_v18 = vmov (!%p113_p2), 2131351028   ;;  %v348_v20 = vmov (!%p113_p2), 2102212464  }
   0x8   : > { %v349_v22 = vmov (!%p113_p2), 920167782   ;;  %v350_v29 = vmov (!%p113_p2), 1326507024  }
   0xc   : > { %v142_v1 = vstv (!%p113_p2), %s140_s13 }
   0xe   : > { %s418_s12 = smov (!%p132_p3, %s302_s12), 1 }
   0xf   : > { %s307_s0 = sshll.u32 %s418_s12, 3 }
  0x10   : > { %s135_s16 = scalar_lea.vmem %s415_s1, %s307_s0  ;;  %s139_s19 = scalar_lea.vmem %s416_s2, %s307_s0 }
  0x11   : > { %v141_v0 = vld [vmem:[%s135_s16] sm:$0xff] }
  0x12   : > { %v385_v2 = vmul.f32 %v142_v1, %v141_v0 }
  0x14   : > { %v147_v3 = vand.u32 2139095040, %v385_v2  ;;  %v144_v5 = vand.u32 2147483647, %v385_v2  ;;  %vm146_vm7 = vcmp.lt.s32.totalorder %v385_v2, 0  ;;  %vm236_vm12 = vweird.f32 %v385_v2 }
  0x16   : > { %v148_v4 = vshrl.u32 %v147_v3, 23  ;;  %v151_v8 = vand.u32 8388607, %v144_v5  ;;  %vm145_vm8 = vcmp.le.f32.partialorder %v144_v5, 0.7853982 }
  0x18   : > { %v309_v6 = vadd.s32 4294967169, %v148_v4  ;;  %v152_v11 = vor.u32 8388608, %v151_v8 }
  0x1a   : > { %v154_v7 = vadd.s32 1, %v309_v6  ;;  %v192_v31 = vshll.u32 %v152_v11, 8 }
  0x1c   : > { %vm155_vm0 = vcmp.gt.s32.totalorder %v154_v7, 0 }
  0x1d   : > { %v156_v9 = vsel %vm155_vm0, %v154_v7, 0 }
  0x1e   : > { %v158_v10 = vand.u32 31, %v156_v9  ;;  %v157_v12 = vshrl.u32 %v156_v9, 5 }
  0x20   : > { %v159_v13 = vsub.s32 32, %v158_v10  ;;  %v161_v15 = vshll.u32 %v345_v14, %v158_v10  ;;  %v164_v17 = vshll.u32 %v346_v16, %v158_v10  ;;  %v167_v19 = vshll.u32 %v347_v18, %v158_v10 }
  0x21   : > { %v170_v21 = vshll.u32 %v348_v20, %v158_v10  ;;  %v173_v23 = vshll.u32 %v349_v22, %v158_v10  ;;  %vm176_vm1 = vcmp.lt.s32.totalorder %v157_v12, 1  ;;  %vm179_vm2 = vcmp.lt.s32.totalorder %v157_v12, 4 }
  0x22   : > { %v160_v24 = vshrl.u32 %v345_v14, %v159_v13  ;;  %v162_v25 = vshrl.u32 %v346_v16, %v159_v13  ;;  %v165_v26 = vshrl.u32 %v347_v18, %v159_v13  ;;  %v168_v27 = vshrl.u32 %v348_v20, %v159_v13 }
  0x23   : > { %v171_v28 = vshrl.u32 %v349_v22, %v159_v13  ;;  %v174_v30 = vshrl.u32 %v350_v29, %v159_v13  ;;  %vm177_vm3 = vcmp.lt.s32.totalorder %v157_v12, 2  ;;  %vm178_vm4 = vcmp.lt.s32.totalorder %v157_v12, 3 }
  0x24   : > { %v163_v32 = vor.u32 %v162_v25, %v161_v15  ;;  %v166_v33 = vor.u32 %v165_v26, %v164_v17  ;;  %v169_v34 = vor.u32 %v168_v27, %v167_v19 }
  0x25   : > { %v172_v35 = vor.u32 %v171_v28, %v170_v21  ;;  %v175_v36 = vor.u32 %v174_v30, %v173_v23 }
  0x26   : > { %v180_v37 = vsel %vm176_vm1, %v160_v24, %v163_v32  ;;  %v181_v38 = vsel %vm179_vm2, %v169_v34, 2102212464  ;;  %v184_v39 = vsel %vm176_vm1, %v163_v32, %v166_v33  ;;  %v188_v40 = vsel %vm176_vm1, %v166_v33, %v169_v34 }
  0x27   : > { %v182_v41 = vsel %vm178_vm4, %v166_v33, %v181_v38  ;;  %v185_v42 = vsel %vm179_vm2, %v172_v35, 920167782  ;;  %v189_v43 = vsel %vm179_vm2, %v175_v36, 1326507024 }
  0x28   : > { %v186_v44 = vsel %vm178_vm4, %v169_v34, %v185_v42  ;;  %v190_v45 = vsel %vm178_vm4, %v172_v35, %v189_v43  ;;  %v183_v46 = vsel %vm177_vm3, %v180_v37, %v182_v41 }
  0x29   : > { %v187_v47 = vsel %vm177_vm3, %v184_v39, %v186_v44  ;;  %v191_v48 = vsel %vm177_vm3, %v188_v40, %v190_v45  ;;  %v199_v53 = vmul.u32 %v192_v31, %v183_v46 }
  0x2a   : > { %v391_v49 = vmul.u32.u64.low %v192_v31, %v191_v48  ;;  %v392_v50 = vmul.u32.u64.high %v192_v31, %v191_v48, %v391_v49  ;;  %v394_v51 = vmul.u32.u64.low %v192_v31, %v187_v47  ;;  %v395_v52 = vmul.u32.u64.high %v192_v31, %v187_v47, %v394_v51 }
  0x2c   : > { %vm201_vm5 = vc.u32 %v392_v50, %v394_v51  ;;  %v202_v54 = vadd.s32 1, %v395_v52  ;;  %v200_v1 = vadd.s32 %v394_v51, %v392_v50 }
  0x2e   : > { %v203_v55 = vsel %vm201_vm5, %v202_v54, %v395_v52 }
  0x2f   : > { %v204_v56 = vadd.s32 %v203_v55, %v199_v53 }
  0x31   : > { %v205_v57 = vadd.s32 536870912, %v204_v56 }
  0x33   : > { %v206_v58 = vshrl.u32 %v205_v57, 30 }
  0x35   : > { %v207_v59 = vshll.u32 %v206_v58, 30  ;;  %v230_v15 = vsub.s32 4, %v206_v58 }
  0x37   : > { %v208_v60 = vsub.s32 %v204_v56, %v207_v59  ;;  %v231_v18 = vsel %vm146_vm7, %v230_v15, %v206_v58 }
  0x38   : > { %v233_v21 = vsel %vm145_vm8, 0, %v231_v18 }
  0x39   : > { %v210_v61 = vsub.s32 0, %v208_v60  ;;  %v237_v22 = vadd.s32 3, %v233_v21 }
  0x3b   : > { %v310_v62 = vmin.u32 %v210_v61, %v208_v60  ;;  %v238_v23 = vand.u32 3, %v237_v22 }
  0x3d   : > { %v212_v63 = vclz %v310_v62  ;;  %vm243_vm9 = vcmp.eq.s32.totalorder %v238_v23, 2  ;;  %vm240_vm10 = vcmp.eq.s32.totalorder %v238_v23, 0  ;;  %vm239_vm11 = vcmp.lt.s32.totalorder %v238_v23, 2 }
  0x3f   : > { %v311_v0 = vadd.s32 4294967294, %v212_v63 }
  0x41   : > { %vm312_vm6 = vcmp.lt.s32.totalorder %v311_v0, 0 }
  0x42   : > { %v215_v3 = vsel %vm312_vm6, 0, %v311_v0 }
  0x43   : > { %v216_v4 = vsub.s32 32, %v215_v3  ;;  %v217_v6 = vshll.u32 %v208_v60, %v215_v3  ;;  %v220_v7 = vsub.s32 4294967266, %v215_v3 }
  0x45   : > { %v218_v8 = vshrl.u32 %v200_v1, %v216_v4  ;;  %v221_v9 = vadd.s32 127, %v220_v7 }
  0x47   : > { %v219_v10 = vor.u32 %v218_v8, %v217_v6  ;;  %v222_v11 = vshll.u32 %v221_v9, 23 }
  0x49   : > { %v223_v12 = vor.u32 4788187, %v222_v11  ;;  %v226_v13 = vcvt.s32.f32 %v219_v10 }
  0x4b   : > { %v224_v14 = vand.u32 2147483647, %v223_v12 }
  0x4d   : > { %v227_v16 = vmul.f32 %v226_v13, %v224_v14 }
  0x4f   : > { %v228_v17 = vxor.u32 2147483648, %v227_v16 }
  0x51   : > { %v229_v19 = vsel %vm146_vm7, %v228_v17, %v227_v16 }
  0x52   : > { %v232_v20 = vsel %vm145_vm8, %v385_v2, %v229_v19 }
  0x53   : > { %333 = vcosq.f32 %v232_v20 }
  0x54   : > { %335 = vsinq.f32 %v232_v20 }
  0x5d   : > { %v334_v24 = vpop.eup %333 }
  0x5e   : > { %v336_v25 = vpop.eup %335  ;;  %v244_v26 = vxor.u32 2147483648, %v334_v24 }
  0x5f   : > { %v241_v27 = vxor.u32 2147483648, %v336_v25 }
  0x60   : > { %v245_v5 = vsel %vm243_vm9, %v244_v26, %v336_v25 }
  0x61   : > { %v242_v28 = vsel %vm240_vm10, %v334_v24, %v241_v27 }
  0x62   : > { %v246_v29 = vsel %vm239_vm11, %v242_v28, %v245_v5 }
  0x63   : > { %v247_v30 = vsel %vm236_vm12, nan, %v246_v29 }
  0x64   : > { %248 = vst [vmem:[%s139_s19] sm:$0xff] %v247_v30 }
  0x65 PF: > { %s13_s11 = sadd.s32 1, %s343_s11  }
  0x66   : > { %p10_p4 = scmp.ge.s32.totalorder %s13_s11, 4  }
  0x68   :  { %12 = sbr.rel (!%p10_p4) target bundleno = 2 (0x2), region = 58 }

</bundles_post_ra>
